<compile_context>
chip_gen: v7x
topology: tpu7x:2x2x1
jax: 0.10.0
libtpu: 0.0.40
codegen_flags: <defaults>
</compile_context>

<pallas_src>
import math

import jax
import jax.numpy as jnp
from jax.experimental import pallas as pl
from jax.experimental.pallas import tpu as pltpu

# ---------------- model config (small, consistent with the module) ----------------
B = 2          # batch
S = 8          # sequence length
D = 32         # d_model
N_HEADS = 2
DH = D // N_HEADS
DFF = 64
EPS = 1e-5     # nn.LayerNorm default

# ---------------- packed-parameter layout ----------------
LANE = 128
# (1, 896) parameter row: each segment starts on a 128-lane boundary (no tile-crossing
# slices inside the kernel).
_G1, _B1, _BQKV, _G2, _B2, _BM1, _BM2 = (i * LANE for i in range(7))
P_ROW = 7 * LANE
# (128, 96) weight slab row offsets: [0:32]=wqkv(D,3D), [32:64]=w1t(D,DFF), [64:128]=w2t(DFF,D)
_WQKV_R, _W1_R, _W2_R = 0, D, 2 * D
W_ROWS, W_COLS = D + D + DFF, 3 * D


# ---------------- Pallas kernel: whole ViT block, whole batch, one invocation -----
def vit_block_kernel(x_ref, prow_ref, wslab_ref, o_ref):
    x = x_ref[...]                                            # (B*S, D) = (16, 32)

    # --- unpack params with static slices of the two packed inputs ---
    g1   = prow_ref[:, _G1:_G1 + D]
    b1   = prow_ref[:, _B1:_B1 + D]
    bqkv = prow_ref[:, _BQKV:_BQKV + 3 * D]
    g2   = prow_ref[:, _G2:_G2 + D]
    b2   = prow_ref[:, _B2:_B2 + D]
    bm1  = prow_ref[:, _BM1:_BM1 + DFF]
    bm2  = prow_ref[:, _BM2:_BM2 + D]

    wqkv = wslab_ref[_WQKV_R:_WQKV_R + D, :]                  # (D, 3D)
    w1t  = wslab_ref[_W1_R:_W1_R + D, 0:DFF]                  # (D, DFF)
    w2t  = wslab_ref[_W2_R:_W2_R + DFF, 0:D]                  # (DFF, D)

    def layernorm(v, gamma, beta):
        mu = jnp.mean(v, axis=-1, keepdims=True)
        var = jnp.mean((v - mu) * (v - mu), axis=-1, keepdims=True)
        return (v - mu) * jax.lax.rsqrt(var + EPS) * gamma + beta

    # ---- norm1 + fused (block-diagonal over heads) QKV projection ----
    n1 = layernorm(x, g1, b1)                                 # (B*S, D)
    qkv = jnp.dot(n1, wqkv,
                  preferred_element_type=jnp.float32) + bqkv  # (B*S, 3D)

    # One explicit K transpose for BOTH heads, hoisted out of the head loop.
    k_t = jnp.swapaxes(qkv[:, D:2 * D].reshape(B, S, D), -1, -2)   # (B, D, S)

    # ---- attention: static loop over heads, batched over batch dim ----
    head_outs = []
    for h in range(N_HEADS):                                  # static, N_HEADS == 2
        lo, hi = h * DH, (h + 1) * DH
        q = qkv[:, lo:hi].reshape(B, S, DH)                   # scale folded into Wq/bq
        kt = k_t[:, lo:hi, :]                                 # (B, DH, S) sublane slice
        v = qkv[:, 2 * D + lo:2 * D + hi].reshape(B, S, DH)

        s = jnp.einsum('bqd,bdk->bqk', q, kt,
                       preferred_element_type=jnp.float32)    # (B, S, S), MXU-natural
        # keep the max-subtract: logit bound for arbitrary inputs is not proven safe
        s = s - jnp.max(s, axis=-1, keepdims=True)
        p = jnp.exp(s)
        denom = jnp.sum(p, axis=-1, keepdims=True)
        # approx reciprocal (EUP slot, off the VALU chain) + one Newton step for accuracy
        r = pl.reciprocal(denom, approx=True)
        r = r * (2.0 - denom * r)
        p = p * r
        o_h = jnp.einsum('bqk,bkd->bqd', p, v,
                         preferred_element_type=jnp.float32)  # (B, S, DH)
        head_outs.append(o_h.reshape(B * S, DH))

    msa = jnp.concatenate(head_outs, axis=-1)                 # (B*S, D)
    out1 = x + msa                                            # residual 1

    # ---- norm2 + MLP (Linear -> GELU(exact) -> Linear) ----
    n2 = layernorm(out1, g2, b2)
    hdn = jnp.dot(n2, w1t, preferred_element_type=jnp.float32) + bm1
    gelu = 0.5 * hdn * (1.0 + jax.lax.erf(hdn * (1.0 / math.sqrt(2.0))))
    y = jnp.dot(gelu, w2t, preferred_element_type=jnp.float32) + bm2

    o_ref[...] = out1 + y                                     # residual 2


# ---------------- wrapper ----------------
@jax.jit
def vit_block(x, packed_params):
    prow, wslab = packed_params
    x2d = x.reshape(B * S, D)

    vmem = pl.BlockSpec(memory_space=pltpu.MemorySpace.VMEM)
    out2d = pl.pallas_call(
        vit_block_kernel,
        out_shape=jax.ShapeDtypeStruct((B * S, D), jnp.float32),
        in_specs=[vmem, vmem, vmem],
        out_specs=vmem,
    )(x2d, prow, wslab)
    return out2d.reshape(B, S, D)


# ---------------- fold per-head params into the packed kernel inputs ----------------
def pack_params(params):
    (g1, b1, wq, bq, wk, bk, wv, bv, g2, b2, w1t, bm1, w2t, bm2) = params
    scale = 1.0 / math.sqrt(DH)

    def blockdiag(w):                                         # (H, DH, DH) -> (D, D)
        m = jnp.zeros((D, D), jnp.float32)
        for h in range(N_HEADS):
            m = m.at[h * DH:(h + 1) * DH, h * DH:(h + 1) * DH].set(w[h])
        return m

    wqkv = jnp.concatenate(
        [blockdiag(wq) * scale, blockdiag(wk), blockdiag(wv)], axis=1)   # (D, 3D)
    bqkv = jnp.concatenate(
        [bq.reshape(1, D) * scale, bk.reshape(1, D), bv.reshape(1, D)], axis=1)  # (1, 3D)

    # (1, 896) parameter row, each segment 128-lane aligned
    seg = lambda v: jnp.pad(v.astype(jnp.float32), ((0, 0), (0, LANE - v.shape[1])))
    prow = jnp.concatenate([seg(g1), seg(b1), seg(bqkv), seg(g2),
                            seg(b2), seg(bm1), seg(bm2)], axis=1)
    assert prow.shape == (1, P_ROW)

    # (128, 96) weight slab, zero-padded to 3D columns
    padw = lambda w: jnp.pad(w.astype(jnp.float32), ((0, 0), (0, W_COLS - w.shape[1])))
    wslab = jnp.concatenate([wqkv, padw(w1t), padw(w2t)], axis=0)
    assert wslab.shape == (W_ROWS, W_COLS)
    return (prow, wslab)


# ---------------- plain-JAX reference (mirrors the PyTorch forward) ----------------
def vit_block_ref(x, params):
    (g1, b1, wq, bq, wk, bk, wv, bv, g2, b2, w1t, bm1, w2t, bm2) = params

    def layernorm(v, gamma, beta):
        mu = jnp.mean(v, axis=-1, keepdims=True)
        var = jnp.mean((v - mu) ** 2, axis=-1, keepdims=True)
        return (v - mu) / jnp.sqrt(var + EPS) * gamma + beta

    outs = []
    for bidx in range(x.shape[0]):
        seq_in = x[bidx]
        n1 = layernorm(seq_in, g1[0], b1[0])
        heads = []
        for h in range(N_HEADS):
            seq = n1[:, h * DH:(h + 1) * DH]
            q = seq @ wq[h] + bq[h]
            k = seq @ wk[h] + bk[h]
            v = seq @ wv[h] + bv[h]
            att = jax.nn.softmax(q @ k.T / math.sqrt(DH), axis=-1)
            heads.append(att @ v)
        out1 = seq_in + jnp.concatenate(heads, axis=-1)
        n2 = layernorm(out1, g2[0], b2[0])
        hdn = n2 @ w1t + bm1[0]
        gelu = 0.5 * hdn * (1.0 + jax.lax.erf(hdn / math.sqrt(2.0)))
        outs.append(out1 + gelu @ w2t + bm2[0])
    return jnp.stack(outs, axis=0)


# ---------------- deterministic parameter init ----------------
def init_params(key):
    ks = jax.random.split(key, 12)
    u = lambda k, shape, lim: jax.random.uniform(k, shape, jnp.float32, -lim, lim)
    lim_h = 1.0 / math.sqrt(DH)
    lim_1 = 1.0 / math.sqrt(D)
    lim_2 = 1.0 / math.sqrt(DFF)

    g1 = jnp.ones((1, D), jnp.float32)
    b1 = jnp.zeros((1, D), jnp.float32)
    # nn.Linear weight is (out,in); kernel/reference consume W^T so sample as (in,out).
    wq = u(ks[0], (N_HEADS, DH, DH), lim_h); bq = u(ks[1], (N_HEADS, DH), lim_h)
    wk = u(ks[2], (N_HEADS, DH, DH), lim_h); bk = u(ks[3], (N_HEADS, DH), lim_h)
    wv = u(ks[4], (N_HEADS, DH, DH), lim_h); bv = u(ks[5], (N_HEADS, DH), lim_h)
    g2 = jnp.ones((1, D), jnp.float32)
    b2 = jnp.zeros((1, D), jnp.float32)
    w1t = u(ks[6], (D, DFF), lim_1);  bm1 = u(ks[7], (1, DFF), lim_1)
    w2t = u(ks[8], (DFF, D), lim_2);  bm2 = u(ks[9], (1, D), lim_2)
    return (g1, b1, wq, bq, wk, bk, wv, bv, g2, b2, w1t, bm1, w2t, bm2)


if __name__ == "__main__":
    key = jax.random.PRNGKey(0)
    kx, kp = jax.random.split(key)
    x = jax.random.normal(kx, (B, S, D), jnp.float32)
    params = init_params(kp)
    packed = pack_params(params)

    out = jax.block_until_ready(vit_block(x, packed))

    ref = vit_block_ref(x, params)
    assert out.shape == (B, S, D)
    assert jnp.allclose(out, ref, atol=1e-4, rtol=1e-4), "mismatch vs reference"
    print("KERNEL_OK")
</pallas_src>

<mosaic_0001>
module attributes {stable_mosaic.version = 11 : i64} {
  func.func @vit_block_kernel(%arg0: memref<16x32xf32, #tpu.memory_space<vmem>>, %arg1: memref<1x896xf32, #tpu.memory_space<vmem>>, %arg2: memref<128x96xf32, #tpu.memory_space<vmem>>, %arg3: memref<16x32xf32, #tpu.memory_space<vmem>>) attributes {dimension_semantics = [], scalar_prefetch = 0 : i64, scratch_operands = 0 : i64, tpu.core_type = #tpu.core_type<tc>} {
    %c0 = arith.constant 0 : index
    %c0_0 = arith.constant 0 : index
    %0 = vector.load %arg0[%c0, %c0_0] : memref<16x32xf32, #tpu.memory_space<vmem>>, vector<16x32xf32>
    %c0_1 = arith.constant 0 : index
    %c0_2 = arith.constant 0 : index
    %1 = vector.load %arg1[%c0_1, %c0_2] : memref<1x896xf32, #tpu.memory_space<vmem>>, vector<1x32xf32>
    %c0_3 = arith.constant 0 : index
    %c128 = arith.constant 128 : index
    %2 = vector.load %arg1[%c0_3, %c128] : memref<1x896xf32, #tpu.memory_space<vmem>>, vector<1x32xf32>
    %c0_4 = arith.constant 0 : index
    %c256 = arith.constant 256 : index
    %3 = vector.load %arg1[%c0_4, %c256] : memref<1x896xf32, #tpu.memory_space<vmem>>, vector<1x96xf32>
    %c0_5 = arith.constant 0 : index
    %c384 = arith.constant 384 : index
    %4 = vector.load %arg1[%c0_5, %c384] : memref<1x896xf32, #tpu.memory_space<vmem>>, vector<1x32xf32>
    %c0_6 = arith.constant 0 : index
    %c512 = arith.constant 512 : index
    %5 = vector.load %arg1[%c0_6, %c512] : memref<1x896xf32, #tpu.memory_space<vmem>>, vector<1x32xf32>
    %c0_7 = arith.constant 0 : index
    %c640 = arith.constant 640 : index
    %6 = vector.load %arg1[%c0_7, %c640] : memref<1x896xf32, #tpu.memory_space<vmem>>, vector<1x64xf32>
    %c0_8 = arith.constant 0 : index
    %c768 = arith.constant 768 : index
    %7 = vector.load %arg1[%c0_8, %c768] : memref<1x896xf32, #tpu.memory_space<vmem>>, vector<1x32xf32>
    %c0_9 = arith.constant 0 : index
    %c0_10 = arith.constant 0 : index
    %8 = vector.load %arg2[%c0_9, %c0_10] : memref<128x96xf32, #tpu.memory_space<vmem>>, vector<32x96xf32>
    %c32 = arith.constant 32 : index
    %c0_11 = arith.constant 0 : index
    %9 = vector.load %arg2[%c32, %c0_11] : memref<128x96xf32, #tpu.memory_space<vmem>>, vector<32x64xf32>
    %c64 = arith.constant 64 : index
    %c0_12 = arith.constant 0 : index
    %10 = vector.load %arg2[%c64, %c0_12] : memref<128x96xf32, #tpu.memory_space<vmem>>, vector<64x32xf32>
    %cst = arith.constant dense<0.000000e+00> : vector<16xf32>
    %11 = vector.multi_reduction <add>, %0, %cst [1] : vector<16x32xf32> to vector<16xf32>
    %12 = vector.shape_cast %11 : vector<16xf32> to vector<16x1xf32>
    %cst_13 = arith.constant 3.200000e+01 : f32
    %13 = vector.broadcast %cst_13 : f32 to vector<16x1xf32>
    %14 = arith.divf %12, %13 : vector<16x1xf32>
    %15 = vector.broadcast %14 : vector<16x1xf32> to vector<16x32xf32>
    %16 = arith.subf %0, %15 : vector<16x32xf32>
    %17 = vector.broadcast %14 : vector<16x1xf32> to vector<16x32xf32>
    %18 = arith.subf %0, %17 : vector<16x32xf32>
    %19 = arith.mulf %16, %18 : vector<16x32xf32>
    %cst_14 = arith.constant dense<0.000000e+00> : vector<16xf32>
    %20 = vector.multi_reduction <add>, %19, %cst_14 [1] : vector<16x32xf32> to vector<16xf32>
    %21 = vector.shape_cast %20 : vector<16xf32> to vector<16x1xf32>
    %cst_15 = arith.constant 3.200000e+01 : f32
    %22 = vector.broadcast %cst_15 : f32 to vector<16x1xf32>
    %23 = arith.divf %21, %22 : vector<16x1xf32>
    %24 = vector.broadcast %14 : vector<16x1xf32> to vector<16x32xf32>
    %25 = arith.subf %0, %24 : vector<16x32xf32>
    %cst_16 = arith.constant 9.99999974E-6 : f32
    %26 = vector.broadcast %cst_16 : f32 to vector<16x1xf32>
    %27 = arith.addf %23, %26 : vector<16x1xf32>
    %28 = math.rsqrt %27 : vector<16x1xf32>
    %29 = vector.broadcast %28 : vector<16x1xf32> to vector<16x32xf32>
    %30 = arith.mulf %25, %29 : vector<16x32xf32>
    %31 = vector.broadcast %1 : vector<1x32xf32> to vector<16x32xf32>
    %32 = arith.mulf %30, %31 : vector<16x32xf32>
    %33 = vector.broadcast %2 : vector<1x32xf32> to vector<16x32xf32>
    %34 = arith.addf %32, %33 : vector<16x32xf32>
    %cst_17 = arith.constant dense<0.000000e+00> : vector<16x96xf32>
    %35 = tpu.matmul %34, %8, %cst_17 {dimension_numbers = #tpu.dot_dimension_numbers<[1], [0], [0], [1], [0, 0, 1, 1], [], []>} : vector<16x32xf32>, vector<32x96xf32>, vector<16x96xf32> -> vector<16x96xf32>
    %36 = vector.broadcast %3 : vector<1x96xf32> to vector<16x96xf32>
    %37 = arith.addf %35, %36 : vector<16x96xf32>
    %38 = vector.extract_strided_slice %37 {offsets = [0, 32], sizes = [16, 32], strides = [1, 1]} : vector<16x96xf32> to vector<16x32xf32>
    %39 = vector.shape_cast %38 : vector<16x32xf32> to vector<2x8x32xf32>
    %40 = tpu.transpose %39, [0, 2, 1] : vector<2x8x32xf32> -> vector<2x32x8xf32>
    %41 = vector.extract_strided_slice %37 {offsets = [0, 0], sizes = [16, 16], strides = [1, 1]} : vector<16x96xf32> to vector<16x16xf32>
    %42 = vector.shape_cast %41 : vector<16x16xf32> to vector<2x8x16xf32>
    %43 = vector.extract_strided_slice %40 {offsets = [0, 0, 0], sizes = [2, 16, 8], strides = [1, 1, 1]} : vector<2x32x8xf32> to vector<2x16x8xf32>
    %44 = vector.extract_strided_slice %37 {offsets = [0, 64], sizes = [16, 16], strides = [1, 1]} : vector<16x96xf32> to vector<16x16xf32>
    %45 = vector.shape_cast %44 : vector<16x16xf32> to vector<2x8x16xf32>
    "tpu.trace_start"() <{level = 10 : i32, message = "bqd,bdk->bqk"}> : () -> ()
    %cst_18 = arith.constant dense<0.000000e+00> : vector<2x8x8xf32>
    %46 = tpu.matmul %42, %43, %cst_18 {dimension_numbers = #tpu.dot_dimension_numbers<[2], [1], [1], [2], [0, 0, 0, 1, 1, 2], [0], [0]>} : vector<2x8x16xf32>, vector<2x16x8xf32>, vector<2x8x8xf32> -> vector<2x8x8xf32>
    "tpu.trace_stop"() : () -> ()
    %cst_19 = arith.constant dense<0xFF800000> : vector<2x8xf32>
    %47 = vector.multi_reduction <maximumf>, %46, %cst_19 [2] : vector<2x8x8xf32> to vector<2x8xf32>
    %48 = vector.shape_cast %47 : vector<2x8xf32> to vector<2x8x1xf32>
    %49 = vector.broadcast %48 : vector<2x8x1xf32> to vector<2x8x8xf32>
    %50 = arith.subf %46, %49 : vector<2x8x8xf32>
    %51 = math.exp %50 : vector<2x8x8xf32>
    %cst_20 = arith.constant dense<0.000000e+00> : vector<2x8xf32>
    %52 = vector.multi_reduction <add>, %51, %cst_20 [2] : vector<2x8x8xf32> to vector<2x8xf32>
    %53 = vector.shape_cast %52 : vector<2x8xf32> to vector<2x8x1xf32>
    %54 = tpu.reciprocal %53 {approx = true} : vector<2x8x1xf32> -> vector<2x8x1xf32>
    %55 = arith.mulf %53, %54 : vector<2x8x1xf32>
    %cst_21 = arith.constant 2.000000e+00 : f32
    %56 = vector.broadcast %cst_21 : f32 to vector<2x8x1xf32>
    %57 = arith.subf %56, %55 : vector<2x8x1xf32>
    %58 = arith.mulf %54, %57 : vector<2x8x1xf32>
    %59 = vector.broadcast %58 : vector<2x8x1xf32> to vector<2x8x8xf32>
    %60 = arith.mulf %51, %59 : vector<2x8x8xf32>
    "tpu.trace_start"() <{level = 10 : i32, message = "bqk,bkd->bqd"}> : () -> ()
    %cst_22 = arith.constant dense<0.000000e+00> : vector<2x8x16xf32>
    %61 = tpu.matmul %60, %45, %cst_22 {dimension_numbers = #tpu.dot_dimension_numbers<[2], [1], [1], [2], [0, 0, 0, 1, 1, 2], [0], [0]>} : vector<2x8x8xf32>, vector<2x8x16xf32>, vector<2x8x16xf32> -> vector<2x8x16xf32>
    "tpu.trace_stop"() : () -> ()
    %62 = vector.shape_cast %61 : vector<2x8x16xf32> to vector<16x16xf32>
    %63 = vector.extract_strided_slice %37 {offsets = [0, 16], sizes = [16, 16], strides = [1, 1]} : vector<16x96xf32> to vector<16x16xf32>
    %64 = vector.shape_cast %63 : vector<16x16xf32> to vector<2x8x16xf32>
    %65 = vector.extract_strided_slice %40 {offsets = [0, 16, 0], sizes = [2, 16, 8], strides = [1, 1, 1]} : vector<2x32x8xf32> to vector<2x16x8xf32>
    %66 = vector.extract_strided_slice %37 {offsets = [0, 80], sizes = [16, 16], strides = [1, 1]} : vector<16x96xf32> to vector<16x16xf32>
    %67 = vector.shape_cast %66 : vector<16x16xf32> to vector<2x8x16xf32>
    "tpu.trace_start"() <{level = 10 : i32, message = "bqd,bdk->bqk"}> : () -> ()
    %cst_23 = arith.constant dense<0.000000e+00> : vector<2x8x8xf32>
    %68 = tpu.matmul %64, %65, %cst_23 {dimension_numbers = #tpu.dot_dimension_numbers<[2], [1], [1], [2], [0, 0, 0, 1, 1, 2], [0], [0]>} : vector<2x8x16xf32>, vector<2x16x8xf32>, vector<2x8x8xf32> -> vector<2x8x8xf32>
    "tpu.trace_stop"() : () -> ()
    %cst_24 = arith.constant dense<0xFF800000> : vector<2x8xf32>
    %69 = vector.multi_reduction <maximumf>, %68, %cst_24 [2] : vector<2x8x8xf32> to vector<2x8xf32>
    %70 = vector.shape_cast %69 : vector<2x8xf32> to vector<2x8x1xf32>
    %71 = vector.broadcast %70 : vector<2x8x1xf32> to vector<2x8x8xf32>
    %72 = arith.subf %68, %71 : vector<2x8x8xf32>
    %73 = math.exp %72 : vector<2x8x8xf32>
    %cst_25 = arith.constant dense<0.000000e+00> : vector<2x8xf32>
    %74 = vector.multi_reduction <add>, %73, %cst_25 [2] : vector<2x8x8xf32> to vector<2x8xf32>
    %75 = vector.shape_cast %74 : vector<2x8xf32> to vector<2x8x1xf32>
    %76 = tpu.reciprocal %75 {approx = true} : vector<2x8x1xf32> -> vector<2x8x1xf32>
    %77 = arith.mulf %75, %76 : vector<2x8x1xf32>
    %cst_26 = arith.constant 2.000000e+00 : f32
    %78 = vector.broadcast %cst_26 : f32 to vector<2x8x1xf32>
    %79 = arith.subf %78, %77 : vector<2x8x1xf32>
    %80 = arith.mulf %76, %79 : vector<2x8x1xf32>
    %81 = vector.broadcast %80 : vector<2x8x1xf32> to vector<2x8x8xf32>
    %82 = arith.mulf %73, %81 : vector<2x8x8xf32>
    "tpu.trace_start"() <{level = 10 : i32, message = "bqk,bkd->bqd"}> : () -> ()
    %cst_27 = arith.constant dense<0.000000e+00> : vector<2x8x16xf32>
    %83 = tpu.matmul %82, %67, %cst_27 {dimension_numbers = #tpu.dot_dimension_numbers<[2], [1], [1], [2], [0, 0, 0, 1, 1, 2], [0], [0]>} : vector<2x8x8xf32>, vector<2x8x16xf32>, vector<2x8x16xf32> -> vector<2x8x16xf32>
    "tpu.trace_stop"() : () -> ()
    %84 = vector.shape_cast %83 : vector<2x8x16xf32> to vector<16x16xf32>
    %85 = tpu.concatenate %62, %84 in 1 : vector<16x16xf32>, vector<16x16xf32> -> vector<16x32xf32>
    %86 = arith.addf %0, %85 : vector<16x32xf32>
    %cst_28 = arith.constant dense<0.000000e+00> : vector<16xf32>
    %87 = vector.multi_reduction <add>, %86, %cst_28 [1] : vector<16x32xf32> to vector<16xf32>
    %88 = vector.shape_cast %87 : vector<16xf32> to vector<16x1xf32>
    %cst_29 = arith.constant 3.200000e+01 : f32
    %89 = vector.broadcast %cst_29 : f32 to vector<16x1xf32>
    %90 = arith.divf %88, %89 : vector<16x1xf32>
    %91 = vector.broadcast %90 : vector<16x1xf32> to vector<16x32xf32>
    %92 = arith.subf %86, %91 : vector<16x32xf32>
    %93 = vector.broadcast %90 : vector<16x1xf32> to vector<16x32xf32>
    %94 = arith.subf %86, %93 : vector<16x32xf32>
    %95 = arith.mulf %92, %94 : vector<16x32xf32>
    %cst_30 = arith.constant dense<0.000000e+00> : vector<16xf32>
    %96 = vector.multi_reduction <add>, %95, %cst_30 [1] : vector<16x32xf32> to vector<16xf32>
    %97 = vector.shape_cast %96 : vector<16xf32> to vector<16x1xf32>
    %cst_31 = arith.constant 3.200000e+01 : f32
    %98 = vector.broadcast %cst_31 : f32 to vector<16x1xf32>
    %99 = arith.divf %97, %98 : vector<16x1xf32>
    %100 = vector.broadcast %90 : vector<16x1xf32> to vector<16x32xf32>
    %101 = arith.subf %86, %100 : vector<16x32xf32>
    %cst_32 = arith.constant 9.99999974E-6 : f32
    %102 = vector.broadcast %cst_32 : f32 to vector<16x1xf32>
    %103 = arith.addf %99, %102 : vector<16x1xf32>
    %104 = math.rsqrt %103 : vector<16x1xf32>
    %105 = vector.broadcast %104 : vector<16x1xf32> to vector<16x32xf32>
    %106 = arith.mulf %101, %105 : vector<16x32xf32>
    %107 = vector.broadcast %4 : vector<1x32xf32> to vector<16x32xf32>
    %108 = arith.mulf %106, %107 : vector<16x32xf32>
    %109 = vector.broadcast %5 : vector<1x32xf32> to vector<16x32xf32>
    %110 = arith.addf %108, %109 : vector<16x32xf32>
    %cst_33 = arith.constant dense<0.000000e+00> : vector<16x64xf32>
    %111 = tpu.matmul %110, %9, %cst_33 {dimension_numbers = #tpu.dot_dimension_numbers<[1], [0], [0], [1], [0, 0, 1, 1], [], []>} : vector<16x32xf32>, vector<32x64xf32>, vector<16x64xf32> -> vector<16x64xf32>
    %112 = vector.broadcast %6 : vector<1x64xf32> to vector<16x64xf32>
    %113 = arith.addf %111, %112 : vector<16x64xf32>
    %cst_34 = arith.constant 5.000000e-01 : f32
    %114 = vector.broadcast %cst_34 : f32 to vector<16x64xf32>
    %115 = arith.mulf %114, %113 : vector<16x64xf32>
    %cst_35 = arith.constant 0.707106769 : f32
    %116 = vector.broadcast %cst_35 : f32 to vector<16x64xf32>
    %117 = arith.mulf %113, %116 : vector<16x64xf32>
    %118 = math.erf %117 : vector<16x64xf32>
    %cst_36 = arith.constant 1.000000e+00 : f32
    %119 = vector.broadcast %cst_36 : f32 to vector<16x64xf32>
    %120 = arith.addf %119, %118 : vector<16x64xf32>
    %121 = arith.mulf %115, %120 : vector<16x64xf32>
    %cst_37 = arith.constant dense<0.000000e+00> : vector<16x32xf32>
    %122 = tpu.matmul %121, %10, %cst_37 {dimension_numbers = #tpu.dot_dimension_numbers<[1], [0], [0], [1], [0, 0, 1, 1], [], []>} : vector<16x64xf32>, vector<64x32xf32>, vector<16x32xf32> -> vector<16x32xf32>
    %123 = vector.broadcast %7 : vector<1x32xf32> to vector<16x32xf32>
    %124 = arith.addf %122, %123 : vector<16x32xf32>
    %125 = arith.addf %86, %124 : vector<16x32xf32>
    %c0_38 = arith.constant 0 : index
    %c0_39 = arith.constant 0 : index
    %126 = vector.load %arg3[%c0_38, %c0_39] : memref<16x32xf32, #tpu.memory_space<vmem>>, vector<16x32xf32>
    tpu.vector_store %arg3[%c0_38, %c0_39], %125 {strides = array<i32>} : memref<16x32xf32, #tpu.memory_space<vmem>>, vector<16x32xf32>,
    return
  }
}

</mosaic_0001>

<bundles_post_ra>
// kernel: vit_block.1
= control target key start
LH: loop header
LB: loop body
LE: loop exit
PB: predicated region body
PF: predicated region fallthrough
CT: control target
= control target key end

     0   :  { %vm40_vm0 = vcmask 261120   ;;  %s1555_s0 = inlined_call_operand.vmem [shape: f32[16,32], index: 0, kind: input, shape index: {}]   ;;  %s1556_s1 = inlined_call_operand.vmem [shape: f32[1,896], index: 1, kind: input, shape index: {}]   ;;  %s1557_s2 = inlined_call_operand.vmem [shape: f32[128,96], index: 2, kind: input, shape index: {}]   ;;  %s1558_s3 = inlined_call_operand.hbm [shape: f32[16,32], index: 3, kind: output, shape index: {}]  }
   0x1   :  { %v1375_v0 = vld [vmem:[%s1555_s0] sm:$0xff]  ;;  %v1380_v1 = vld [vmem:[%s1555_s0 + $0x8] sm:$0xff] }
   0x2   :  { %8 = vsyncpa [#allocation3], 0  ;;  %v41_v2 = vsel %vm40_vm0, %v1375_v0, 0.0  ;;  %v44_v3 = vsel %vm40_vm0, %v1380_v1, 0.0  ;;  %v24_v14 = vld [vmem:[%s1557_s2] sm:$0xff]  ;;  %v25_v15 = vld [vmem:[%s1557_s2 + $0x8] sm:$0xff] }
   0x3   :  { %42 = vadd.xlane.f32.xlu0 %v41_v2  ;;  %v26_v16 = vld [vmem:[%s1557_s2 + $0x10] sm:$0xff]  ;;  %v1246_v17 = vpack.c.bf16 %v25_v15, %v24_v14  ;;  %v27_v18 = vld [vmem:[%s1557_s2 + $0x18] sm:$0xff]  ;;  %v1102_v27 = vld [vmem:[%s1556_s1] ss:$0 sm:$0xff]  ;;  %v1341_v36 = vmov 0.0   ;;  %vm1342_vm1 = vmmov 0  }
   0x4   :  { %v1250_v19 = vpack.c.bf16 %v27_v18, %v26_v16  ;;  %v1103_v29 = vld [vmem:[%s1556_s1 + $0x1] ss:$0 sm:$0xff]  ;;  %1181 = vmatprep.subr.mxu1 %v1341_v36  ;;  %1183 = vmatprep.mubr.msk.f32.mxu1 %vm1342_vm1, %v1341_v36  ;;  %v1104_v37 = vld [vmem:[%s1556_s1 + $0x2] ss:$0 sm:$0xff]  ;;  %s1343_s29 = smov 96   ;;  %vm174_vm2 = vcmask 130048  }
   0x5   :  { %1247 = vmatprep.subr.bf16.mxu0 %v1246_v17  ;;  %vm326_vm3 = vcmask 64512   ;;  %s1344_s30 = smov 64   ;;  %s1345_s4 = smov 80   ;;  %vm1000_vm4 = vcmask 523264  }
   0x6   :  { %1249 = vmatpush3.bf16.msra.mxu0 %v1246_v17  ;;  %s1346_s5 = smov 112   ;;  %s1347_s6 = smov 48  }
   0x7   :  { %45 = vadd.xlane.f32.xlu0 %v44_v3  ;;  %1251 = vmatprep.subr.bf16.mxu0 %v1250_v19  ;;  %s1348_s7 = smov 16   ;;  %s1349_s11 = smov [#allocation2]  }
   0x8   :  { %s1091_s12 = sshll.u32 %s1349_s11, 4  ;;  %s1092_s12 = int_to_ptr.vmem [resolvable:$true] %s1091_s12 }
   0x9   :  { %s1317_s13 = scalar_lea.vmem %s1092_s12, 256  ;;  %p1322_p1 = scmp.lt.s32.totalorder %s1092_s12, %s1092_s12 }
   0xa   :  { %1253 = vmatpush3.bf16.msra.mxu0 %v1250_v19  ;;  %p1318_p0 = scmp.ne.s32.totalorder %s1092_s12, %s1317_s13  ;;  %p1323_p2 = scmp.lt.s32.totalorder %s1317_s13, %s1317_s13 }
   0xb   :  { %1176 = vmatprep.subr.mxu0 %v1341_v36 }
   0xc   :  { %p1324_p3 = por %p1323_p2, %p1322_p1 }
   0xe   :  { %p1325_p4 = pnand %p1324_p3, %p1318_p0 }
  0x90   :  { %v43_v4 = vpop.xlane.xlu0 %42 }
  0x91   :  { %v48_v5 = vmul.f32 0.03125, %v43_v4 }
  0x93   :  { %v50_v6 = vsub.f32 %v1375_v0, %v48_v5 }
  0x94   :  { %v46_v7 = vpop.xlane.xlu0 %45 }
  0x95   :  { %v49_v8 = vmul.f32 0.03125, %v46_v7  ;;  %v52_v9 = vmul.f32 %v50_v6, %v50_v6 }
  0x97   :  { %v51_v10 = vsub.f32 %v1380_v1, %v49_v8  ;;  %v54_v11 = vsel %vm40_vm0, %v52_v9, 0.0 }
  0x98   :  { %55 = vadd.xlane.f32.xlu1 %v54_v11 }
  0x99   :  { %v53_v12 = vmul.f32 %v51_v10, %v51_v10 }
  0x9b   :  { %v57_v13 = vsel %vm40_vm0, %v53_v12, 0.0 }
  0x9c   :  { %58 = vadd.xlane.f32.xlu1 %v57_v13 }
 0x125   :  { %v56_v20 = vpop.xlane.xlu1 %55 }
 0x126   :  { %v60_v21 = vmul.f32 0.03125, %v56_v20 }
 0x128   :  { %v62_v22 = vadd.f32 1e-05, %v60_v21 }
 0x129   :  { %v59_v23 = vpop.xlane.xlu1 %58 }
 0x12a   :  { %1289 = vrsqrt.f32 %v62_v22  ;;  %v61_v24 = vmul.f32 0.03125, %v59_v23 }
 0x12c   :  { %v63_v25 = vadd.f32 1e-05, %v61_v24 }
 0x12e   :  { %1291 = vrsqrt.f32 %v63_v25 }
 0x134   :  { %v1290_v26 = vpop.eup %1289 }
 0x135   :  { %v66_v28 = vmul.f32 %v1290_v26, %v50_v6 }
 0x137   :  { %v74_v30 = vmul.f32 %v1102_v27, %v66_v28 }
 0x138   :  { %v1292_v31 = vpop.eup %1291 }
 0x139   :  { %v67_v32 = vmul.f32 %v1292_v31, %v51_v10  ;;  %v82_v33 = vadd.f32 %v1103_v29, %v74_v30 }
 0x13b   :  { %v75_v34 = vmul.f32 %v1102_v27, %v67_v32  ;;  %1173 = vmatprep.mubr.msk.f32.mxu0 %vm40_vm0, %v82_v33 }
 0x13d   :  { %v83_v35 = vadd.f32 %v1103_v29, %v75_v34 }
 0x13f   :  { %1174 = vmatmul.mubr.msk.f32.vlgmr.msra.gmra.mrb[0].mxu0 %vm40_vm0, %v83_v35 }
 0x140   :  { %1178 = vmatprep.mubr.msk.f32.mxu0 %vm1342_vm1, %v1341_v36 }
 0x212   :  { %v1175_v38 = vpop.f32.mrb[0].mxu0 }
 0x213   :  { %v1419_v39 = vadd.f32 %v1175_v38, %v1104_v37  ;;  %v162_v40 = vpop.f32.mrb[1].mxu0 }
 0x214   :  { %v1421_v41 = vadd.f32 %v1104_v37, %v162_v40 }
 0x215   :  { %250 = vrot.lane.b32.xlu1 %v1419_v39, %s1343_s29 }
 0x216   :  { %172 = vrot.lane.b32.xlu0 %v1421_v41, %s1343_s29 }
 0x287   :  { %v251_v42 = vpop.permute.xlu1 %250 }
 0x288   :  { %1182 = vmatpush3.xpose.msk.msra.mxu1 %vm174_vm2, %v251_v42  ;;  %v173_v43 = vpop.permute.xlu0 %172 }
 0x289   :  { %1177 = vmatpush3.xpose.msk.msra.mxu0 %vm174_vm2, %v173_v43  ;;  %1191 = vmatprep.subr.mxu1 %v1341_v36 }
 0x28a   :  { %1186 = vmatprep.subr.mxu0 %v1341_v36 }
 0x28b   :  { %1184 = vmatmul.mubr.msk.f32.vlgmr.msra.gmra.mrb[0].mxu1 %vm174_vm2, %v1419_v39 }
 0x28c   :  { %1179 = vmatmul.mubr.msk.f32.vlgmr.msra.gmra.mrb[2].mxu0 %vm174_vm2, %v1421_v41  ;;  %1193 = vmatprep.mubr.msk.f32.mxu1 %vm1342_vm1, %v1341_v36 }
 0x28d   :  { %1188 = vmatprep.mubr.msk.f32.mxu0 %vm1342_vm1, %v1341_v36 }
 0x35e   :  { %v322_v44 = vpop.f32.mrb[0].mxu1 }
 0x35f   :  { %v245_v45 = vpop.f32.mrb[2].mxu0  ;;  %v1185_v46 = vpop.f32.mrb[1].mxu1  ;;  %v330_v47 = vsel %vm326_vm3, %v322_v44, -inf }
 0x360   :  { %331 = vmax.xlane.f32.xlu0 %v330_v47  ;;  %v1180_v48 = vpop.f32.mrb[3].mxu0  ;;  %v327_v49 = vsel %vm326_vm3, %v245_v45, -inf }
 0x361   :  { %328 = vmax.xlane.f32.xlu1 %v327_v49 }
 0x3ed   :  { %v332_v50 = vpop.xlane.xlu0 %331 }
 0x3ee   :  { %v334_v51 = vsub.f32 %v322_v44, %v332_v50  ;;  %v329_v52 = vpop.xlane.xlu1 %328 }
 0x3ef   :  { %v333_v53 = vsub.f32 %v245_v45, %v329_v52 }
 0x3f0   :  { %v337_v54 = vmul.f32 1.442695, %v334_v51 }
 0x3f1   :  { %v335_v55 = vmul.f32 1.442695, %v333_v53 }
 0x3f2   :  { %1293 = vpow2.f32 %v337_v54 }
 0x3f3   :  { %1295 = vpow2.f32 %v335_v55 }
 0x3fc   :  { %v1294_v56 = vpop.eup %1293 }
 0x3fd   :  { %v1296_v57 = vpop.eup %1295  ;;  %v342_v58 = vsel %vm326_vm3, %v1294_v56, 0.0 }
 0x3fe   :  { %343 = vadd.xlane.f32.xlu1 %v342_v58  ;;  %v339_v59 = vsel %vm326_vm3, %v1296_v57, 0.0 }
 0x3ff   :  { %340 = vadd.xlane.f32.xlu0 %v339_v59 }
 0x40f   :  { %431 = vrot.lane.b32.xlu1 %v1419_v39, %s1344_s30 }
 0x413   :  { %509 = vrot.lane.b32.xlu1 %v1421_v41, %s1345_s4 }
 0x415   :  { %355 = vrot.lane.b32.xlu0 %v1421_v41, %s1344_s30 }
 0x417   :  { %587 = vrot.lane.b32.xlu1 %v1419_v39, %s1345_s4 }
 0x419   :  { %507 = vrot.lane.b32.xlu0 %v1421_v41, %s1346_s5 }
 0x41b   :  { %585 = vrot.lane.b32.xlu1 %v1419_v39, %s1346_s5 }
 0x48b   :  { %v344_v60 = vpop.xlane.xlu1 %343 }
 0x48c   :  { %1297 = vrcp.f32 %v344_v60  ;;  %v341_v61 = vpop.xlane.xlu0 %340 }
 0x48d   :  { %1299 = vrcp.f32 %v341_v61 }
 0x48f   :  { %v432_v62 = vpop.permute.xlu1 %431 }
 0x490   :  { %1192 = vmatpush3.msra.mxu1 %v432_v62  ;;  %v356_v63 = vpop.permute.xlu0 %355 }
 0x491   :  { %1187 = vmatpush3.msra.mxu0 %v356_v63  ;;  %1201 = vmatprep.subr.mxu1 %v1341_v36 }
 0x492   :  { %1196 = vmatprep.subr.mxu0 %v1341_v36 }
 0x493   :  { %v510_v3 = vpop.permute.xlu1 %509 }
 0x494   :  { %v508_v15 = vpop.permute.xlu0 %507 }
 0x496   :  { %v1298_v2 = vpop.eup %1297 }
 0x497   :  { %v1300_v4 = vpop.eup %1299  ;;  %v348_v5 = vmul.f32 %v1298_v2, %v344_v60  ;;  %v588_v11 = vpop.permute.xlu1 %587 }
 0x498   :  { %v347_v6 = vmul.f32 %v1300_v4, %v341_v61 }
 0x499   :  { %v350_v7 = vsub.f32 2.0, %v348_v5 }
 0x49a   :  { %v349_v8 = vsub.f32 2.0, %v347_v6 }
 0x49b   :  { %v352_v9 = vmul.f32 %v1298_v2, %v350_v7  ;;  %v586_v14 = vpop.permute.xlu1 %585 }
 0x49c   :  { %v351_v10 = vmul.f32 %v1300_v4, %v349_v8  ;;  %v28_v8 = vld [vmem:[%s1557_s2 + $0x20] sm:$0xff] }
 0x49d   :  { %v354_v12 = vmul.f32 %v1294_v56, %v352_v9  ;;  %v29_v9 = vld [vmem:[%s1557_s2 + $0x28] sm:$0xff] }
 0x49e   :  { %v353_v13 = vmul.f32 %v1296_v57, %v351_v10  ;;  %v1254_v10 = vpack.c.bf16 %v29_v9, %v28_v8 }
 0x49f   :  { %1194 = vmatmul.mubr.msk.f32.vlgmr.msra.gmra.mrb[2].mxu1 %vm326_vm3, %v354_v12  ;;  %v31_v12 = vld [vmem:[%s1557_s2 + $0x38] sm:$0xff] }
 0x4a0   :  { %1202 = vmatpush3.xpose.msk.msra.mxu1 %vm174_vm2, %v588_v11  ;;  %1189 = vmatmul.mubr.msk.f32.vlgmr.msra.gmra.mrb[4].mxu0 %vm326_vm3, %v353_v13  ;;  %v30_v11 = vld [vmem:[%s1557_s2 + $0x30] sm:$0xff] }
 0x4a1   :  { %1197 = vmatpush3.xpose.msk.msra.mxu0 %vm174_vm2, %v510_v3  ;;  %1203 = vmatprep.mubr.msk.f32.mxu1 %vm1342_vm1, %v1341_v36  ;;  %v1258_v13 = vpack.c.bf16 %v31_v12, %v30_v11 }
 0x4a2   :  { %1198 = vmatprep.mubr.msk.f32.mxu0 %vm1342_vm1, %v1341_v36  ;;  %1211 = vmatprep.subr.mxu1 %v1341_v36 }
 0x4a3   :  { %1204 = vmatmul.mubr.msk.f32.vlgmr.msra.gmra.mrb[4].mxu1 %vm174_vm2, %v586_v14  ;;  %1206 = vmatprep.subr.mxu0 %v1341_v36 }
 0x4a4   :  { %1199 = vmatmul.mubr.msk.f32.vlgmr.msra.gmra.mrb[6].mxu0 %vm174_vm2, %v508_v15  ;;  %1213 = vmatprep.mubr.msk.f32.mxu1 %vm1342_vm1, %v1341_v36 }
 0x4a5   :  { %1208 = vmatprep.mubr.msk.f32.mxu0 %vm1342_vm1, %v1341_v36 }
 0x572   :  { %v503_v16 = vpop.f32.mrb[2].mxu1 }
 0x573   :  { %v427_v17 = vpop.f32.mrb[4].mxu0  ;;  %v1195_v18 = vpop.f32.mrb[3].mxu1 }
 0x574   :  { %v1190_v19 = vpop.f32.mrb[5].mxu0 }
 0x576   :  { %v659_v20 = vpop.f32.mrb[4].mxu1 }
 0x577   :  { %v581_v21 = vpop.f32.mrb[6].mxu0  ;;  %v1205_v22 = vpop.f32.mrb[5].mxu1  ;;  %v666_v23 = vsel %vm326_vm3, %v659_v20, -inf }
 0x578   :  { %667 = vmax.xlane.f32.xlu1 %v666_v23  ;;  %v1200_v24 = vpop.f32.mrb[7].mxu0  ;;  %v663_v25 = vsel %vm326_vm3, %v581_v21, -inf  ;;  %v1120_v23 = vld [vmem:[%s1556_s1 + $0x4] ss:$0 sm:$0xff] }
 0x579   :  { %664 = vmax.xlane.f32.xlu0 %v663_v25 }
 0x589   :  { %767 = vrot.lane.b32.xlu1 %v1419_v39, %s1347_s6 }
 0x605   :  { %v668_v26 = vpop.xlane.xlu1 %667 }
 0x606   :  { %v670_v27 = vsub.f32 %v659_v20, %v668_v26  ;;  %v665_v28 = vpop.xlane.xlu0 %664 }
 0x607   :  { %v669_v29 = vsub.f32 %v581_v21, %v665_v28  ;;  %v1119_v21 = vld [vmem:[%s1556_s1 + $0x3] ss:$0 sm:$0xff] }
 0x608   :  { %v673_v30 = vmul.f32 1.442695, %v670_v27 }
 0x609   :  { %v671_v31 = vmul.f32 1.442695, %v669_v29  ;;  %v768_v32 = vpop.permute.xlu1 %767 }
 0x60a   :  { %1212 = vmatpush3.msra.mxu1 %v768_v32 }
 0x60b   :  { %1301 = vpow2.f32 %v671_v31  ;;  %v33_v31 = vld [vmem:[%s1557_s2 + $0x48] sm:$0xff] }
 0x60c   :  { %1303 = vpow2.f32 %v673_v30  ;;  %v32_v30 = vld [vmem:[%s1557_s2 + $0x40] sm:$0xff] }
 0x60d   :  { %v1262_v32 = vpack.c.bf16 %v33_v31, %v32_v30 }
 0x60f   :  { %1263 = vmatprep.subr.bf16.mxu1 %v1262_v32 }
 0x615   :  { %v1302_v33 = vpop.eup %1301 }
 0x616   :  { %v675_v34 = vsel %vm326_vm3, %v1302_v33, 0.0  ;;  %v1304_v35 = vpop.eup %1303 }
 0x617   :  { %676 = vadd.xlane.f32.xlu0 %v675_v34  ;;  %v678_v36 = vsel %vm326_vm3, %v1304_v35, 0.0  ;;  %v35_v34 = vld [vmem:[%s1557_s2 + $0x58] sm:$0xff] }
 0x61b   :  { %679 = vadd.xlane.f32.xlu0 %v678_v36  ;;  %v36_v36 = vld [vmem:[%s1557_s2 + $0x60] sm:$0xff] }
 0x631   :  { %691 = vrot.lane.b32.xlu0 %v1421_v41, %s1347_s6 }
 0x6a4   :  { %v677_v37 = vpop.xlane.xlu0 %676 }
 0x6a5   :  { %1305 = vrcp.f32 %v677_v37 }
 0x6a8   :  { %v680_v38 = vpop.xlane.xlu0 %679 }
 0x6a9   :  { %1307 = vrcp.f32 %v680_v38 }
 0x6ac   :  { %v692_v39 = vpop.permute.xlu0 %691 }
 0x6ad   :  { %1207 = vmatpush3.msra.mxu0 %v692_v39  ;;  %v38_v39 = vld [vmem:[%s1557_s2 + $0x70] sm:$0xff] }
 0x6ae   :  { %1255 = vmatprep.subr.bf16.mxu0 %v1254_v10 }
 0x6af   :  { %v1306_v40 = vpop.eup %1305 }
 0x6b0   :  { %v683_v42 = vmul.f32 %v1306_v40, %v677_v37  ;;  %v37_v37 = vld [vmem:[%s1557_s2 + $0x68] sm:$0xff] }
 0x6b2   :  { %v685_v43 = vsub.f32 2.0, %v683_v42 }
 0x6b3   :  { %v1308_v44 = vpop.eup %1307 }
 0x6b4   :  { %v687_v45 = vmul.f32 %v1306_v40, %v685_v43  ;;  %v684_v46 = vmul.f32 %v1308_v44, %v680_v38  ;;  %v1270_v38 = vpack.c.bf16 %v37_v37, %v36_v36  ;;  %v39_v40 = vld [vmem:[%s1557_s2 + $0x78] sm:$0xff]  ;;  %v1121_v43 = vld [vmem:[%s1556_s1 + $0x5] ss:$0 sm:$0xff] }
 0x6b5   :  { %v1274_v42 = vpack.c.bf16 %v39_v40, %v38_v39 }
 0x6b6   :  { %v689_v47 = vmul.f32 %v1302_v33, %v687_v45  ;;  %v686_v48 = vsub.f32 2.0, %v684_v46  ;;  %v34_v33 = vld [vmem:[%s1557_s2 + $0x50] sm:$0xff] }
 0x6b8   :  { %v688_v49 = vmul.f32 %v1308_v44, %v686_v48  ;;  %1209 = vmatmul.mubr.msk.f32.vlgmr.msra.gmra.mrb[8].mxu0 %vm326_vm3, %v689_v47 }
 0x6b9   :  { %1257 = vmatpush3.bf16.msra.mxu0 %v1254_v10 }
 0x6ba   :  { %v690_v50 = vmul.f32 %v1304_v35, %v688_v49  ;;  %1259 = vmatprep.subr.bf16.mxu0 %v1258_v13  ;;  %v1266_v35 = vpack.c.bf16 %v35_v34, %v34_v33 }
 0x6bc   :  { %1214 = vmatmul.mubr.msk.f32.vlgmr.msra.gmra.mrb[6].mxu1 %vm326_vm3, %v690_v50 }
 0x6bd   :  { %1261 = vmatpush3.bf16.msra.mxu0 %v1258_v13  ;;  %1265 = vmatpush3.bf16.msra.mxu1 %v1262_v32 }
 0x6be   :  { %1267 = vmatprep.subr.bf16.mxu1 %v1266_v35 }
 0x6c1   :  { %1269 = vmatpush3.bf16.msra.mxu1 %v1266_v35 }
 0x6c2   :  { %1271 = vmatprep.subr.bf16.mxu1 %v1270_v38 }
 0x6c5   :  { %1273 = vmatpush3.bf16.msra.mxu1 %v1270_v38 }
 0x6c6   :  { %1275 = vmatprep.subr.bf16.mxu1 %v1274_v42 }
 0x6c9   :  { %1277 = vmatpush3.bf16.msra.mxu1 %v1274_v42 }
 0x78b   :  { %v763_v41 = vpop.f32.mrb[8].mxu0 }
 0x78c   :  { %845 = vrot.lane.b32.xlu1 %v763_v41, %s1348_s7  ;;  %v1210_v51 = vpop.f32.mrb[9].mxu0 }
 0x78f   :  { %v839_v52 = vpop.f32.mrb[6].mxu1 }
 0x790   :  { %v1215_v53 = vpop.f32.mrb[7].mxu1  ;;  %847 = vrot.lane.b32.xlu1 %v839_v52, %s1348_s7 }
 0x7fe   :  { %v846_v54 = vpop.permute.xlu1 %845 }
 0x7ff   :  { %v851_v55 = vsel %vm174_vm2, %v427_v17, %v846_v54 }
 0x800   :  { %v1475_v56 = vadd.f32 %v851_v55, %v1375_v0 }
 0x802   :  { %v848_v57 = vpop.permute.xlu1 %847  ;;  %v855_v58 = vsel %vm40_vm0, %v1475_v56, 0.0 }
 0x803   :  { %v852_v59 = vsel %vm174_vm2, %v503_v16, %v848_v57  ;;  %856 = vadd.xlane.f32.xlu0 %v855_v58  ;;  %v1124_v58 = vld [vmem:[%s1556_s1 + $0x6] ss:$0 sm:$0xff] }
 0x804   :  { %v1481_v60 = vadd.f32 %v852_v59, %v1380_v1 }
 0x806   :  { %v858_v61 = vsel %vm40_vm0, %v1481_v60, 0.0 }
 0x807   :  { %859 = vadd.xlane.f32.xlu1 %v858_v61 }
 0x890   :  { %v857_v62 = vpop.xlane.xlu0 %856 }
 0x891   :  { %v861_v63 = vmul.f32 0.03125, %v857_v62 }
 0x893   :  { %v863_v2 = vsub.f32 %v1475_v56, %v861_v63 }
 0x894   :  { %v860_v0 = vpop.xlane.xlu1 %859 }
 0x895   :  { %v862_v3 = vmul.f32 0.03125, %v860_v0  ;;  %v865_v4 = vmul.f32 %v863_v2, %v863_v2 }
 0x897   :  { %v864_v5 = vsub.f32 %v1481_v60, %v862_v3  ;;  %v867_v6 = vsel %vm40_vm0, %v865_v4, 0.0 }
 0x898   :  { %868 = vadd.xlane.f32.xlu0 %v867_v6 }
 0x899   :  { %v866_v7 = vmul.f32 %v864_v5, %v864_v5 }
 0x89b   :  { %v870_v1 = vsel %vm40_vm0, %v866_v7, 0.0 }
 0x89c   :  { %871 = vadd.xlane.f32.xlu0 %v870_v1 }
 0x925   :  { %v869_v14 = vpop.xlane.xlu0 %868 }
 0x926   :  { %v873_v15 = vmul.f32 0.03125, %v869_v14 }
 0x928   :  { %v875_v16 = vadd.f32 1e-05, %v873_v15 }
 0x929   :  { %v872_v17 = vpop.xlane.xlu0 %871 }
 0x92a   :  { %1309 = vrsqrt.f32 %v875_v16  ;;  %v874_v18 = vmul.f32 0.03125, %v872_v17 }
 0x92c   :  { %v876_v19 = vadd.f32 1e-05, %v874_v18 }
 0x92e   :  { %1311 = vrsqrt.f32 %v876_v19 }
 0x934   :  { %v1310_v20 = vpop.eup %1309 }
 0x935   :  { %v879_v22 = vmul.f32 %v1310_v20, %v863_v2 }
 0x937   :  { %v887_v24 = vmul.f32 %v1119_v21, %v879_v22 }
 0x938   :  { %v1312_v25 = vpop.eup %1311 }
 0x939   :  { %v880_v26 = vmul.f32 %v1312_v25, %v864_v5  ;;  %v895_v27 = vadd.f32 %v1120_v23, %v887_v24 }
 0x93b   :  { %v888_v28 = vmul.f32 %v1119_v21, %v880_v26  ;;  %1224 = vmatprep.mubr.msk.f32.mxu0 %vm40_vm0, %v895_v27 }
 0x93d   :  { %v896_v29 = vadd.f32 %v1120_v23, %v888_v28 }
 0x93f   :  { %1225 = vmatmul.mubr.msk.f32.vlgmr.msra.gmra.mrb[10].mxu0 %vm40_vm0, %v896_v29 }
 0xa12   :  { %v1226_v44 = vpop.f32.mrb[10].mxu0 }
 0xa13   :  { %v981_v45 = vadd.f32 %v1226_v44, %v1121_v43  ;;  %v975_v46 = vpop.f32.mrb[11].mxu0 }
 0xa14   :  { %v976_v47 = vadd.f32 %v1121_v43, %v975_v46 }
 0xa15   :  { %v987_v48 = vmul.f32 0.70710677, %v981_v45  ;;  %v985_v54 = vmul.f32 0.5, %v981_v45 }
 0xa16   :  { %v986_v49 = vmul.f32 0.70710677, %v976_v47  ;;  %v984_v52 = vmul.f32 0.5, %v976_v47 }
 0xa17   :  { %1313 = verf.f32 %v987_v48 }
 0xa18   :  { %1315 = verf.f32 %v986_v49 }
 0xa21   :  { %v1314_v50 = vpop.eup %1313 }
 0xa22   :  { %v1316_v41 = vpop.eup %1315  ;;  %v991_v51 = vadd.f32 1.0, %v1314_v50 }
 0xa23   :  { %v990_v53 = vadd.f32 1.0, %v1316_v41 }
 0xa24   :  { %v993_v57 = vmul.f32 %v991_v51, %v985_v54 }
 0xa25   :  { %v992_v55 = vmul.f32 %v990_v53, %v984_v52 }
 0xa27   :  { %1243 = vmatprep.mubr.msk.f32.mxu1 %vm1000_vm4, %v992_v55 }
 0xa28   :  { %1244 = vmatmul.mubr.msk.f32.vlgmr.msra.gmra.mrb[8].mxu1 %vm1000_vm4, %v993_v57 }
 0xafb   :  { %v1245_v59 = vpop.f32.mrb[8].mxu1 }
 0xafc   :  { %v1079_v61 = vadd.f32 %v1245_v59, %v1124_v58  ;;  %v1073_v62 = vpop.f32.mrb[9].mxu1 }
 0xafd   :  { %v1074_v63 = vadd.f32 %v1124_v58, %v1073_v62 }
 0xafe   :  { %v1083_v2 = vadd.f32 %v1079_v61, %v1481_v60 }
 0xaff   :  { %v1082_v0 = vadd.f32 %v1074_v63, %v1475_v56 }
 0xb00   :  { %1085 = vst.msk [vmem:[#allocation2 + $0x8] sm:$0xff] %vm40_vm0, %v1083_v2 }
 0xb01   :  { %1084 = vst.msk [vmem:[#allocation2] sm:$0xff] %vm40_vm0, %v1082_v0 }
 0xb02   :  { %1328 = shalt.err (!%p1325_p4)
}
 0xb03   :  { %s1329_s15 = scalar_lea.hbm %s1558_s3, 256 }
 0xb04   :  { %p1330_p5 = scmp.ne.s32.totalorder %s1558_s3, %s1329_s15  ;;  %p1333_p6 = scmp.lt.u32.totalorder %s1329_s15, %s1558_s3 }
 0xb06   :  { %p1335_p7 = pnand %p1333_p6, %p1330_p5 }
 0xb08   :  { %1338 = shalt.err (!%p1335_p7)
}
 0xb09   :  { %s1350_s19 = smov 128   ;;  %s1351_s20 = smov 8  }
 0xb0a   :  { %1097 = dma.vmem_to_hbm [thread:$0]  %s1092_s12, 256, %s1558_s3, [#allocation3], %s1350_s19, %s1350_s19, %s1351_s20  }
 0xb0b   :  { %1339 = dma.done.wait [#allocation3], 256  }
 0xb0c   :  { %1340 = vsyncadd [#allocation3], 4294967040 }
 0xb0d   :  { %1101 = vsyncpa [#allocation3], 1 }

</bundles_post_ra>
